<compile_context>
chip_gen: v7x
topology: tpu7x:2x2x1
jax: 0.10.0
libtpu: 0.0.40
codegen_flags: <defaults>
</compile_context>

<pallas_src>
import jax
import jax.numpy as jnp
from jax.experimental import pallas as pl
from jax.experimental.pallas import tpu as pltpu

_LANE = 128


def _round_up(a, b):
    return (a + b - 1) // b * b


def _cdiv(a, b):
    return (a + b - 1) // b


def _choose_tiles(N, Cin, Cout, HW, itemsize):
    """Pick (Nb, THW): batch sub-block and lane-dense spatial tile."""
    TARGET_STEP_BYTES = 2 << 20   # ~2 MiB of HBM traffic per grid step
    VMEM_BUDGET = 12 << 20        # cap for double-buffered (x + out) tiles

    bytes_per_col = (Cin + Cout) * itemsize   # per batch row, per spatial column

    # Largest lane-aligned THW whose double-buffered x+out tiles fit the budget
    # (keeps large-Cin cases safe on v7x's smaller VMEM).
    max_thw = max(_LANE, (VMEM_BUDGET // (2 * bytes_per_col)) // _LANE * _LANE)
    THW = min(_round_up(HW, _LANE), max_thw)

    # Batch sub-block: grow until the per-step byte target is met (amortizes
    # the fixed per-grid-step overhead when HW is small).
    Nb = 1
    step_bytes = bytes_per_col * THW
    if N > 1 and step_bytes < TARGET_STEP_BYTES:
        want = min(N, max(1, TARGET_STEP_BYTES // step_bytes))
        for d in range(int(want), 0, -1):
            if N % d == 0 and 2 * d * step_bytes <= VMEM_BUDGET:
                Nb = d
                break

    # v7x has 2 TensorCores: make sure the ("parallel","parallel") grid has at
    # least 2 steps to shard (harmless on single-core v5e/v6e).
    if (N // Nb) * _cdiv(HW, THW) < 2:
        if Nb > 1:                       # split along batch first
            for d in range((N + 1) // 2, 0, -1):
                if N % d == 0:
                    Nb = d
                    break
        elif HW > _LANE:                 # otherwise split the spatial axis
            THW = max(_LANE, _round_up(_cdiv(HW, 2), _LANE))

    return Nb, THW


def _make_vpu_kernel(cin, cout):
    """Small-channel path: unrolled VPU multiply-accumulate, f32 SMEM scalars."""

    def kernel(w_ref, b_ref, x_ref, o_ref):
        # w_ref: (cout*cin,) f32 SMEM   b_ref: (cout,) f32 SMEM
        # x_ref: (Nb, cin, THW) VMEM    o_ref: (Nb, cout, THW) VMEM
        for co in range(cout):
            acc = x_ref[:, 0, :] * w_ref[co * cin]
            for ci in range(1, cin):
                acc = acc + x_ref[:, ci, :] * w_ref[co * cin + ci]
            o_ref[:, co, :] = (acc + b_ref[co]).astype(o_ref.dtype)

    return kernel


def _make_mxu_kernel(nb):
    """General path for larger channel counts: per-batch-row MXU matmul + bias."""

    def kernel(w_ref, b_ref, x_ref, o_ref):
        # w_ref: (Cout, Cin)   b_ref: (Cout, 1)
        # x_ref: (nb, Cin, THW)   o_ref: (nb, Cout, THW)
        w = w_ref[...]
        b = b_ref[...].astype(jnp.float32)
        for i in range(nb):
            acc = jnp.dot(w, x_ref[i], preferred_element_type=jnp.float32)
            o_ref[i] = (acc + b).astype(o_ref.dtype)

    return kernel


def out_conv(x_nchw, weight, bias):
    """1x1 Conv2d forward (NCHW), matching nn.Conv2d(in, out, kernel_size=1).

    x_nchw : (N, Cin, H, W)
    weight : (Cout, Cin, 1, 1)   (PyTorch Conv2d weight layout)
    bias   : (Cout,)
    returns: (N, Cout, H, W)
    """
    N, Cin, H, W = x_nchw.shape
    Cout = weight.shape[0]
    HW = H * W
    itemsize = jnp.dtype(x_nchw.dtype).itemsize

    Nb, THW = _choose_tiles(N, Cin, Cout, HW, itemsize)
    grid = (N // Nb, _cdiv(HW, THW))

    # Free reshape (H, W contiguous in NCHW): no transposes, no padding, no
    # post-slice; ragged last spatial blocks are masked by the pipeline.
    x = x_nchw.reshape(N, Cin, HW)

    x_spec = pl.BlockSpec((Nb, Cin, THW), lambda n, j: (n, 0, j))
    out_spec = pl.BlockSpec((Nb, Cout, THW), lambda n, j: (n, 0, j))

    small_channels = (Cin <= 8) and (Cout <= 8)
    if small_channels:
        kernel = _make_vpu_kernel(Cin, Cout)
        # SMEM is 32-bit scalar memory: flatten weight to 1-D and cast to f32.
        w_arg = weight.reshape(Cout * Cin).astype(jnp.float32)
        b_arg = bias.astype(jnp.float32)
        in_specs = [
            pl.BlockSpec(memory_space=pltpu.MemorySpace.SMEM),  # weight (flat)
            pl.BlockSpec(memory_space=pltpu.MemorySpace.SMEM),  # bias
            x_spec,
        ]
    else:
        kernel = _make_mxu_kernel(Nb)
        w_arg = weight.reshape(Cout, Cin)
        b_arg = bias.reshape(Cout, 1)
        in_specs = [
            pl.BlockSpec((Cout, Cin), lambda n, j: (0, 0)),     # weight, resident
            pl.BlockSpec((Cout, 1), lambda n, j: (0, 0)),       # bias, resident
            x_spec,
        ]

    cost = pl.CostEstimate(
        flops=2 * N * HW * Cin * Cout,
        transcendentals=0,
        bytes_accessed=N * (Cin + Cout) * HW * itemsize
        + (Cout * Cin + Cout) * 4,
    )

    out = pl.pallas_call(
        kernel,
        out_shape=jax.ShapeDtypeStruct((N, Cout, HW), x_nchw.dtype),
        grid=grid,
        in_specs=in_specs,
        out_specs=out_spec,
        compiler_params=pltpu.CompilerParams(
            dimension_semantics=("parallel", "parallel")),
        cost_estimate=cost,
    )(w_arg, b_arg, x)

    return out.reshape(N, Cout, H, W)


def _ref_out_conv(x, weight, bias):
    Cout, Cin = weight.shape[0], weight.shape[1]
    return (jnp.einsum("nchw,oc->nohw", x, weight.reshape(Cout, Cin))
            + bias.reshape(1, Cout, 1, 1))


if __name__ == "__main__":
    # Shapes consistent with the module: batch=2, in_channel=4, out_channel=3,
    # spatial 16x16 (small-channel VPU path).
    N, Cin, Cout, Hs, Ws = 2, 4, 3, 16, 16
    key = jax.random.PRNGKey(0)
    kx, kw, kb = jax.random.split(key, 3)

    x = jax.random.normal(kx, (N, Cin, Hs, Ws), dtype=jnp.float32)
    weight = jax.random.normal(kw, (Cout, Cin, 1, 1), dtype=jnp.float32) * 0.1
    bias = jax.random.normal(kb, (Cout,), dtype=jnp.float32) * 0.1

    out = jax.block_until_ready(out_conv(x, weight, bias))
    ref = _ref_out_conv(x, weight, bias)
    assert out.shape == (N, Cout, Hs, Ws)
    assert jnp.allclose(out, ref, atol=1e-5, rtol=1e-5)

    # Secondary check: larger channels (MXU path) + ragged H*W (<128 columns,
    # exercises the masked partial spatial block — no host pad/slice anymore).
    N2, Cin2, Cout2, H2, W2 = 1, 16, 16, 10, 10
    k2x, k2w, k2b = jax.random.split(jax.random.PRNGKey(1), 3)
    x2 = jax.random.normal(k2x, (N2, Cin2, H2, W2), dtype=jnp.float32)
    w2 = jax.random.normal(k2w, (Cout2, Cin2, 1, 1), dtype=jnp.float32) * 0.1
    b2 = jax.random.normal(k2b, (Cout2,), dtype=jnp.float32) * 0.1

    out2 = jax.block_until_ready(out_conv(x2, w2, b2))
    ref2 = _ref_out_conv(x2, w2, b2)
    assert out2.shape == (N2, Cout2, H2, W2)
    assert jnp.allclose(out2, ref2, atol=1e-4, rtol=1e-4)

    print("KERNEL_OK")
</pallas_src>

<mosaic_0001>
module attributes {stable_mosaic.version = 11 : i64} {
  func.func @kernel(%arg0: i32, %arg1: i32, %arg2: memref<12xf32, #tpu.memory_space<smem>>, %arg3: memref<3xf32, #tpu.memory_space<smem>>, %arg4: memref<1x4x256xf32, #tpu.memory_space<vmem>>, %arg5: memref<1x3x256xf32, #tpu.memory_space<vmem>>) attributes {dimension_semantics = [#tpu.dimension_semantics<parallel>, #tpu.dimension_semantics<parallel>], iteration_bounds = array<i64: 2, 1>, scalar_prefetch = 0 : i64, scratch_operands = 0 : i64, tpu.core_type = #tpu.core_type<tc>, window_params = [{transform_indices = @transform_0, window_bounds = array<i64: 12>}, {transform_indices = @transform_1, window_bounds = array<i64: 3>}, {transform_indices = @transform_2, window_bounds = array<i64: 1, 4, 256>}, {transform_indices = @transform_3, window_bounds = array<i64: 1, 3, 256>}]} {
    %c0 = arith.constant 0 : index
    %c0_0 = arith.constant 0 : index
    %c0_1 = arith.constant 0 : index
    %0 = vector.load %arg4[%c0, %c0_0, %c0_1] : memref<1x4x256xf32, #tpu.memory_space<vmem>>, vector<1x1x256xf32>
    %1 = vector.shape_cast %0 : vector<1x1x256xf32> to vector<1x256xf32>
    %c0_2 = arith.constant 0 : index
    %2 = memref.load %arg2[%c0_2] : memref<12xf32, #tpu.memory_space<smem>>
    %3 = vector.broadcast %2 : f32 to vector<1x256xf32>
    %4 = arith.mulf %1, %3 : vector<1x256xf32>
    %c0_3 = arith.constant 0 : index
    %c1 = arith.constant 1 : index
    %c0_4 = arith.constant 0 : index
    %5 = vector.load %arg4[%c0_3, %c1, %c0_4] : memref<1x4x256xf32, #tpu.memory_space<vmem>>, vector<1x1x256xf32>
    %6 = vector.shape_cast %5 : vector<1x1x256xf32> to vector<1x256xf32>
    %c1_5 = arith.constant 1 : index
    %7 = memref.load %arg2[%c1_5] : memref<12xf32, #tpu.memory_space<smem>>
    %8 = vector.broadcast %7 : f32 to vector<1x256xf32>
    %9 = arith.mulf %6, %8 : vector<1x256xf32>
    %10 = arith.addf %4, %9 : vector<1x256xf32>
    %c0_6 = arith.constant 0 : index
    %c2 = arith.constant 2 : index
    %c0_7 = arith.constant 0 : index
    %11 = vector.load %arg4[%c0_6, %c2, %c0_7] : memref<1x4x256xf32, #tpu.memory_space<vmem>>, vector<1x1x256xf32>
    %12 = vector.shape_cast %11 : vector<1x1x256xf32> to vector<1x256xf32>
    %c2_8 = arith.constant 2 : index
    %13 = memref.load %arg2[%c2_8] : memref<12xf32, #tpu.memory_space<smem>>
    %14 = vector.broadcast %13 : f32 to vector<1x256xf32>
    %15 = arith.mulf %12, %14 : vector<1x256xf32>
    %16 = arith.addf %10, %15 : vector<1x256xf32>
    %c0_9 = arith.constant 0 : index
    %c3 = arith.constant 3 : index
    %c0_10 = arith.constant 0 : index
    %17 = vector.load %arg4[%c0_9, %c3, %c0_10] : memref<1x4x256xf32, #tpu.memory_space<vmem>>, vector<1x1x256xf32>
    %18 = vector.shape_cast %17 : vector<1x1x256xf32> to vector<1x256xf32>
    %c3_11 = arith.constant 3 : index
    %19 = memref.load %arg2[%c3_11] : memref<12xf32, #tpu.memory_space<smem>>
    %20 = vector.broadcast %19 : f32 to vector<1x256xf32>
    %21 = arith.mulf %18, %20 : vector<1x256xf32>
    %22 = arith.addf %16, %21 : vector<1x256xf32>
    %c0_12 = arith.constant 0 : index
    %23 = memref.load %arg3[%c0_12] : memref<3xf32, #tpu.memory_space<smem>>
    %24 = vector.broadcast %23 : f32 to vector<1x256xf32>
    %25 = arith.addf %22, %24 : vector<1x256xf32>
    %c0_13 = arith.constant 0 : index
    %c0_14 = arith.constant 0 : index
    %c0_15 = arith.constant 0 : index
    %26 = vector.load %arg5[%c0_13, %c0_14, %c0_15] : memref<1x3x256xf32, #tpu.memory_space<vmem>>, vector<1x1x256xf32>
    %27 = vector.shape_cast %26 : vector<1x1x256xf32> to vector<1x256xf32>
    %28 = vector.shape_cast %25 : vector<1x256xf32> to vector<1x1x256xf32>
    tpu.vector_store %arg5[%c0_13, %c0_14, %c0_15], %28 {strides = array<i32>} : memref<1x3x256xf32, #tpu.memory_space<vmem>>, vector<1x1x256xf32>,
    %c0_16 = arith.constant 0 : index
    %c0_17 = arith.constant 0 : index
    %c0_18 = arith.constant 0 : index
    %29 = vector.load %arg4[%c0_16, %c0_17, %c0_18] : memref<1x4x256xf32, #tpu.memory_space<vmem>>, vector<1x1x256xf32>
    %30 = vector.shape_cast %29 : vector<1x1x256xf32> to vector<1x256xf32>
    %c4 = arith.constant 4 : index
    %31 = memref.load %arg2[%c4] : memref<12xf32, #tpu.memory_space<smem>>
    %32 = vector.broadcast %31 : f32 to vector<1x256xf32>
    %33 = arith.mulf %30, %32 : vector<1x256xf32>
    %c0_19 = arith.constant 0 : index
    %c1_20 = arith.constant 1 : index
    %c0_21 = arith.constant 0 : index
    %34 = vector.load %arg4[%c0_19, %c1_20, %c0_21] : memref<1x4x256xf32, #tpu.memory_space<vmem>>, vector<1x1x256xf32>
    %35 = vector.shape_cast %34 : vector<1x1x256xf32> to vector<1x256xf32>
    %c5 = arith.constant 5 : index
    %36 = memref.load %arg2[%c5] : memref<12xf32, #tpu.memory_space<smem>>
    %37 = vector.broadcast %36 : f32 to vector<1x256xf32>
    %38 = arith.mulf %35, %37 : vector<1x256xf32>
    %39 = arith.addf %33, %38 : vector<1x256xf32>
    %c0_22 = arith.constant 0 : index
    %c2_23 = arith.constant 2 : index
    %c0_24 = arith.constant 0 : index
    %40 = vector.load %arg4[%c0_22, %c2_23, %c0_24] : memref<1x4x256xf32, #tpu.memory_space<vmem>>, vector<1x1x256xf32>
    %41 = vector.shape_cast %40 : vector<1x1x256xf32> to vector<1x256xf32>
    %c6 = arith.constant 6 : index
    %42 = memref.load %arg2[%c6] : memref<12xf32, #tpu.memory_space<smem>>
    %43 = vector.broadcast %42 : f32 to vector<1x256xf32>
    %44 = arith.mulf %41, %43 : vector<1x256xf32>
    %45 = arith.addf %39, %44 : vector<1x256xf32>
    %c0_25 = arith.constant 0 : index
    %c3_26 = arith.constant 3 : index
    %c0_27 = arith.constant 0 : index
    %46 = vector.load %arg4[%c0_25, %c3_26, %c0_27] : memref<1x4x256xf32, #tpu.memory_space<vmem>>, vector<1x1x256xf32>
    %47 = vector.shape_cast %46 : vector<1x1x256xf32> to vector<1x256xf32>
    %c7 = arith.constant 7 : index
    %48 = memref.load %arg2[%c7] : memref<12xf32, #tpu.memory_space<smem>>
    %49 = vector.broadcast %48 : f32 to vector<1x256xf32>
    %50 = arith.mulf %47, %49 : vector<1x256xf32>
    %51 = arith.addf %45, %50 : vector<1x256xf32>
    %c1_28 = arith.constant 1 : index
    %52 = memref.load %arg3[%c1_28] : memref<3xf32, #tpu.memory_space<smem>>
    %53 = vector.broadcast %52 : f32 to vector<1x256xf32>
    %54 = arith.addf %51, %53 : vector<1x256xf32>
    %c0_29 = arith.constant 0 : index
    %c1_30 = arith.constant 1 : index
    %c0_31 = arith.constant 0 : index
    %55 = vector.load %arg5[%c0_29, %c1_30, %c0_31] : memref<1x3x256xf32, #tpu.memory_space<vmem>>, vector<1x1x256xf32>
    %56 = vector.shape_cast %55 : vector<1x1x256xf32> to vector<1x256xf32>
    %57 = vector.shape_cast %54 : vector<1x256xf32> to vector<1x1x256xf32>
    tpu.vector_store %arg5[%c0_29, %c1_30, %c0_31], %57 {strides = array<i32>} : memref<1x3x256xf32, #tpu.memory_space<vmem>>, vector<1x1x256xf32>,
    %c0_32 = arith.constant 0 : index
    %c0_33 = arith.constant 0 : index
    %c0_34 = arith.constant 0 : index
    %58 = vector.load %arg4[%c0_32, %c0_33, %c0_34] : memref<1x4x256xf32, #tpu.memory_space<vmem>>, vector<1x1x256xf32>
    %59 = vector.shape_cast %58 : vector<1x1x256xf32> to vector<1x256xf32>
    %c8 = arith.constant 8 : index
    %60 = memref.load %arg2[%c8] : memref<12xf32, #tpu.memory_space<smem>>
    %61 = vector.broadcast %60 : f32 to vector<1x256xf32>
    %62 = arith.mulf %59, %61 : vector<1x256xf32>
    %c0_35 = arith.constant 0 : index
    %c1_36 = arith.constant 1 : index
    %c0_37 = arith.constant 0 : index
    %63 = vector.load %arg4[%c0_35, %c1_36, %c0_37] : memref<1x4x256xf32, #tpu.memory_space<vmem>>, vector<1x1x256xf32>
    %64 = vector.shape_cast %63 : vector<1x1x256xf32> to vector<1x256xf32>
    %c9 = arith.constant 9 : index
    %65 = memref.load %arg2[%c9] : memref<12xf32, #tpu.memory_space<smem>>
    %66 = vector.broadcast %65 : f32 to vector<1x256xf32>
    %67 = arith.mulf %64, %66 : vector<1x256xf32>
    %68 = arith.addf %62, %67 : vector<1x256xf32>
    %c0_38 = arith.constant 0 : index
    %c2_39 = arith.constant 2 : index
    %c0_40 = arith.constant 0 : index
    %69 = vector.load %arg4[%c0_38, %c2_39, %c0_40] : memref<1x4x256xf32, #tpu.memory_space<vmem>>, vector<1x1x256xf32>
    %70 = vector.shape_cast %69 : vector<1x1x256xf32> to vector<1x256xf32>
    %c10 = arith.constant 10 : index
    %71 = memref.load %arg2[%c10] : memref<12xf32, #tpu.memory_space<smem>>
    %72 = vector.broadcast %71 : f32 to vector<1x256xf32>
    %73 = arith.mulf %70, %72 : vector<1x256xf32>
    %74 = arith.addf %68, %73 : vector<1x256xf32>
    %c0_41 = arith.constant 0 : index
    %c3_42 = arith.constant 3 : index
    %c0_43 = arith.constant 0 : index
    %75 = vector.load %arg4[%c0_41, %c3_42, %c0_43] : memref<1x4x256xf32, #tpu.memory_space<vmem>>, vector<1x1x256xf32>
    %76 = vector.shape_cast %75 : vector<1x1x256xf32> to vector<1x256xf32>
    %c11 = arith.constant 11 : index
    %77 = memref.load %arg2[%c11] : memref<12xf32, #tpu.memory_space<smem>>
    %78 = vector.broadcast %77 : f32 to vector<1x256xf32>
    %79 = arith.mulf %76, %78 : vector<1x256xf32>
    %80 = arith.addf %74, %79 : vector<1x256xf32>
    %c2_44 = arith.constant 2 : index
    %81 = memref.load %arg3[%c2_44] : memref<3xf32, #tpu.memory_space<smem>>
    %82 = vector.broadcast %81 : f32 to vector<1x256xf32>
    %83 = arith.addf %80, %82 : vector<1x256xf32>
    %c0_45 = arith.constant 0 : index
    %c2_46 = arith.constant 2 : index
    %c0_47 = arith.constant 0 : index
    %84 = vector.load %arg5[%c0_45, %c2_46, %c0_47] : memref<1x3x256xf32, #tpu.memory_space<vmem>>, vector<1x1x256xf32>
    %85 = vector.shape_cast %84 : vector<1x1x256xf32> to vector<1x256xf32>
    %86 = vector.shape_cast %83 : vector<1x256xf32> to vector<1x1x256xf32>
    tpu.vector_store %arg5[%c0_45, %c2_46, %c0_47], %86 {strides = array<i32>} : memref<1x3x256xf32, #tpu.memory_space<vmem>>, vector<1x1x256xf32>,
    return
  }
  func.func @transform_0(%arg0: i32, %arg1: i32) -> i32 {
    %c0_i32 = arith.constant 0 : i32
    %c0_i32_0 = arith.constant 0 : i32
    return %c0_i32 : i32
  }
  func.func @transform_1(%arg0: i32, %arg1: i32) -> i32 {
    %c0_i32 = arith.constant 0 : i32
    %c0_i32_0 = arith.constant 0 : i32
    return %c0_i32 : i32
  }
  func.func @transform_2(%arg0: i32, %arg1: i32) -> (i32, i32, i32) {
    %c0_i32 = arith.constant 0 : i32
    %c0_i32_0 = arith.constant 0 : i32
    return %arg0, %c0_i32, %arg1 : i32, i32, i32
  }
  func.func @transform_3(%arg0: i32, %arg1: i32) -> (i32, i32, i32) {
    %c0_i32 = arith.constant 0 : i32
    %c0_i32_0 = arith.constant 0 : i32
    return %arg0, %c0_i32, %arg1 : i32, i32, i32
  }
}

</mosaic_0001>

<bundles_post_ra>
// kernel: tpu_custom_call.1
= control target key start
LH: loop header
LB: loop body
LE: loop exit
PB: predicated region body
PF: predicated region fallthrough
CT: control target
= control target key end

     0   :  { %8 = vsyncpa [#allocation4], 0  ;;  %s908_s0 = inlined_call_operand.hbm [shape: f32[12], index: 0, kind: input, shape index: {}]   ;;  %s909_s1 = inlined_call_operand.vmem [shape: f32[3], index: 1, kind: input, shape index: {}]   ;;  %s910_s2 = inlined_call_operand.hbm [shape: f32[2,4,256], index: 2, kind: input, shape index: {}]   ;;  %s911_s3 = inlined_call_operand.vmem [shape: f32[2,3,256], index: 3, kind: output, shape index: {}]  }
   0x1   :  { %9 = vsyncpa [#allocation5], 0 }
   0x2   :  { %10 = vsyncpa [#allocation3], 0 }
   0x3   :  { %12 = vsyncpa [#allocation3 + $0x1], 0  ;;  %s699_s12 = smov 0   ;;  %s701_s13 = smov 0  }
   0x4   :  { %s703_s14 = smov 0   ;;  %s705_s15 = smov 0  }
   0x5   :  { %s707_s16 = smov 0   ;;  %s709_s17 = smov 0  }
   0x6 LB: > { %s439_s18 = sadd.s32 4294967295, %s674_s17   ;;  %p94_p0 = scmp.ne.s32.totalorder %s658_s13, %s654_s12  ;;  %s674_s17 = sphi %s709_s17, %s18_s17   ;;  %s670_s16 = sphi %s707_s16, %s929_s16   ;;  %s666_s15 = sphi %s705_s15, %s928_s15   ;;  %s662_s14 = sphi %s703_s14, %s927_s14   ;;  %s658_s13 = sphi %s701_s13, %s926_s13   ;;  %s654_s12 = sphi %s699_s12, %s925_s12  }
   0x7   : > { %p729_p1 = scmp.eq.s32.totalorder %s439_s18, 0  ;;  %p441_p2 = scmp.ge.s32.totalorder %s674_s17, 1 }
   0x8   : > { %p133_p3 = scmp.lt.s32.totalorder %s674_s17, 3  ;;  %s155_s24 = sshll.u32 %s909_s1, 4  ;;  %s156_s24 = int_to_ptr.vmem [resolvable:$true] %s155_s24 }
   0x9   : > { %s915_s19 = scalar_select %p729_p1, 1, 0 }
   0xa   : > { %p737_p4 = por %p729_p1, %p94_p0  ;;  %p741_p5 = pnand %p441_p2, %p133_p3 }
   0xb   : > { %s30_s26 = sadd.s32 1, %s670_s16  ;;  %s558_s30 = scalar_lea.hbm %s908_s0, 16 }
   0xc   : > { %s916_s20 = scalar_select %p737_p4, 1, 0 }
   0xd   : > { %p492_p6 = pneg %p741_p5  ;;  %p757_p8 = scmp.ge.s32.totalorder %s30_s26, 2 }
   0xe   : > { %p559_p9 = scmp.ne.s32.totalorder %s908_s0, %s558_s30  ;;  %p565_p13 = scmp.lt.u32.totalorder %s558_s30, %s908_s0 }
   0xf   : > { %p752_p7 = pnand %p492_p6, %p729_p1 }
  0x11   : > { %p560_p10 = pneg %p752_p7 }
  0x13   : > { %p561_p11 = pnand %p560_p10, %p559_p9 }
  0x15   : > { %p562_p12 = pneg %p561_p11 }
  0x17   : > { %p567_p0 = pnand %p565_p13, %p562_p12 }
  0x19   : > { %570 = shalt.err (!%p567_p0)
}
  0x1a   : > { %s676_s8 = smov [#allocation2]   ;;  %s571_s11 = scalar_lea.vmem %s156_s24, 16 }
  0x1b   : > { %495 = dma.hbm_to_smem (!%p752_p7), %s908_s0, 16, %s676_s8, [#allocation4]  }
  0x1c   : > { %p572_p2 = scmp.ne.s32.totalorder %s156_s24, %s571_s11  ;;  %p579_p4 = scmp.lt.s32.totalorder %s156_s24, %s156_s24 }
  0x1d   : > { %p580_p9 = scmp.lt.s32.totalorder %s571_s11, %s571_s11 }
  0x1e   : > { %p574_p3 = pnand %p572_p2, %p560_p10 }
  0x1f   : > { %p581_p11 = por %p580_p9, %p579_p4 }
  0x20   : > { %p575_p6 = pneg %p574_p3 }
  0x22   : > { %p582_p1 = pnand %p581_p11, %p575_p6 }
  0x24   : > { %585 = shalt.err (!%p582_p1)
}
  0x25   : > { %s677_s12 = smov [#allocation6]   ;;  %s931_s26 = smov (%p757_p8, %s30_s26), 0 }
  0x26   : > { %498 = dma.vmem_to_smem (!%p752_p7), %s156_s24, 16, %s677_s12, [#allocation5]  }
  0x27   : > { %s81_s18 = sadd.s32 1, %s662_s14  ;;  %p88_p1 = scmp.ne.s32.totalorder %s662_s14, %s658_s13 }
  0x28   : > { %s76_s22 = ssub.s32 %s670_s16, %s931_s26  ;;  %p89_p4 = scmp.eq.s32.totalorder %s674_s17, 0 }
  0x29   : > { %p79_p10 = scmp.eq.s32.totalorder %s76_s22, 0  ;;  %p505_p12 = scmp.lt.s32.totalorder %s674_s17, 2 }
  0x2a   : > { %p90_p13 = por %p89_p4, %p88_p1  ;;  %s166_s23 = sand.u32 1, %s662_s14  }
  0x2b   : > { %s792_s25 = scalar_select %p79_p10, %s662_s14, %s81_s18  }
  0x2c   : > { %s445_s28 = sshll.u32 %s166_s23, 3  ;;  %s480_s29 = sshll.u32 %s670_s16, 7 }
  0x2d   : > { %s798_s24 = scalar_lea.hbm %s910_s2, %s480_s29  ;;  %s170_s27 = scalar_lea.vmem [#allocation7], %s445_s28 }
  0x2e   : > { %s180_s5 = sshll.u32 %s170_s27, 4  ;;  %p802_p7 = pnand %p505_p12, %p90_p13  ;;  %s800_s5 = int_to_ptr.vmem [resolvable:$true] %s180_s5 }
  0x2f   : > { %s167_s7 = scalar_lea.sflag [#allocation3], %s166_s23  ;;  %s586_s8 = scalar_lea.hbm %s798_s24, 128 }
  0x30   : > { %p587_p8 = scmp.ne.s32.totalorder %s798_s24, %s586_s8  ;;  %p588_p0 = pneg %p802_p7 }
  0x31   : > { %s591_s11 = scalar_lea.hbm %s910_s2, 256  ;;  %p592_p6 = scmp.lt.u32.totalorder %s798_s24, %s910_s2 }
  0x32   : > { %p589_p2 = pnand %p588_p0, %p587_p8  ;;  %p593_p9 = scmp.lt.u32.totalorder %s591_s11, %s586_s8 }
  0x33   : > { %p595_p1 = scmp.lt.u32.totalorder %s586_s8, %s798_s24 }
  0x34   : > { %p590_p3 = pneg %p589_p2  ;;  %p594_p11 = por %p593_p9, %p592_p6 }
  0x36   : > { %p596_p4 = por %p595_p1, %p594_p11 }
  0x38   : > { %p597_p10 = pnand %p596_p4, %p590_p3 }
  0x3a   : > { %600 = shalt.err (!%p597_p10)
}
  0x3b   : > { %s601_s22 = scalar_lea.vmem %s800_s5, 128  ;;  %s678_s23 = smov [#allocation7]  }
  0x3c   : > { %p602_p12 = scmp.ne.s32.totalorder %s800_s5, %s601_s22  ;;  %s606_s28 = sshll.u32 %s678_s23, 4  ;;  %s607_s28 = int_to_ptr.vmem [resolvable:$false] %s606_s28 }
  0x3d   : > { %s608_s29 = scalar_lea.vmem %s607_s28, 256  ;;  %p609_p2 = scmp.lt.s32.totalorder %s800_s5, %s607_s28 }
  0x3e   : > { %p604_p13 = pnand %p602_p12, %p588_p0  ;;  %p610_p6 = scmp.lt.s32.totalorder %s608_s29, %s601_s22 }
  0x40   : > { %p605_p8 = pneg %p604_p13  ;;  %p611_p9 = por %p610_p6, %p609_p2 }
  0x42   : > { %p612_p11 = pnand %p611_p9, %p605_p8 }
  0x44   : > { %615 = shalt.err (!%p612_p11)
}
  0x45   : > { %502 = dma.hbm_to_vmem [thread:$0]  (!%p802_p7), %s798_s24, 128, %s800_s5, %s167_s7  }
  0x46   : > { %189 = sbr.rel (%p741_p5) target bundleno = 110 (0x6e), region = 32  ;;  %p921_p0 = scmp.ne.s32.totalorder (!%p741_p5), %s915_s19, 0 }
  0x4d   : > { %641 = dma.done.wait (%p921_p0), [#allocation4], 16  }
  0x4e   : > { %643 = vsyncadd (%p921_p0), [#allocation4], 4294967280 }
  0x4f   : > { %645 = dma.done.wait (%p921_p0), [#allocation5], 16  }
  0x50   : > { %647 = vsyncadd (%p921_p0), [#allocation5], 4294967280  ;;  %s199_s30 = sand.u32 1, %s658_s13   ;;  %p922_p5 = scmp.ne.s32.totalorder %s916_s20, 0 }
  0x51   : > { %s451_s4 = sshll.u32 %s199_s30, 3  ;;  %s200_s24 = scalar_lea.sflag [#allocation3], %s199_s30 }
  0x52   : > { %s842_s27 = scalar_lea.vmem [#allocation7], %s451_s4 }
  0x53   : > { %649 = dma.done.wait (%p922_p5), %s200_s24, 128  }
  0x54   : > { %651 = vsyncadd (%p922_p5), %s200_s24, 4294967168 }
  0x55   : > { %208 = sfence }
  0x56   : > { %p233_p7 = scmp.lt.s32.totalorder %s666_s15, 1  ;;  %s243_s19 = sld [smem:[#allocation2]]  ;;  %v242_v0 = vld [vmem:[%s842_s27] ss:$4 sm:$0x3]  ;;  %v267_v15 = vlaneseq }
  0x57   : > { %s455_s21 = sld [smem:[#allocation2 + $0x1]]  ;;  %s457_s5 = sld [smem:[#allocation2 + $0x2]]  ;;  %v454_v1 = vld [vmem:[%s842_s27 + $0x1] ss:$4 sm:$0x3] }
  0x58   : > { %s933_s15 = smov (!%p233_p7, %s666_s15), 1  ;;  %s459_s6 = sld [smem:[#allocation2 + $0x3]]  ;;  %v456_v5 = vld [vmem:[%s842_s27 + $0x2] ss:$4 sm:$0x3]  ;;  %vm875_vm0 = vcmp.lt.s32.totalorder %v267_v15, 256 }
  0x59   : > { %s854_s20 = sld [smem:[#allocation6]]  ;;  %s460_s7 = sld [smem:[#allocation2 + $0x4]]  ;;  %v458_v7 = vld [vmem:[%s842_s27 + $0x3] ss:$4 sm:$0x3] }
  0x5a   : > { %s462_s8 = sld [smem:[#allocation2 + $0x5]]  ;;  %s464_s9 = sld [smem:[#allocation2 + $0x6]]  ;;  %v272_v9 = vld [vmem:[%s842_s27] ss:$4 sm:$0x3] }
  0x5b   : > { %s858_s10 = sld [smem:[#allocation2 + $0x7]]  ;;  %v461_v10 = vld [vmem:[%s842_s27 + $0x1] ss:$4 sm:$0x3]  ;;  %s862_s11 = sld [smem:[#allocation6 + $0x1]] }
  0x5c   : > { %v244_v2 = vstv %s243_s19  ;;  %s469_s12 = sld [smem:[#allocation2 + $0x8]]  ;;  %v463_v16 = vld [vmem:[%s842_s27 + $0x2] ss:$4 sm:$0x3]  ;;  %s865_s18 = sld [smem:[#allocation2 + $0x9]] }
  0x5d   : > { %v245_v3 = vmul.f32 %v244_v2, %v242_v0  ;;  %v249_v4 = vstv %s455_s21  ;;  %v255_v8 = vstv %s457_s5  ;;  %s481_s22 = sshll.u32 %s933_s15, 3  ;;  %v465_v20 = vld [vmem:[%s842_s27 + $0x3] ss:$4 sm:$0x3]  ;;  %s473_s23 = sld [smem:[#allocation2 + $0xa]] }
  0x5e   : > { %v250_v6 = vmul.f32 %v454_v1, %v249_v4  ;;  %v256_v12 = vmul.f32 %v456_v5, %v255_v8  ;;  %v261_v13 = vstv %s459_s6  ;;  %s475_s28 = sld [smem:[#allocation2 + $0xb]]  ;;  %v296_v28 = vld [vmem:[%s842_s27] ss:$4 sm:$0x3]  ;;  %s240_s30 = scalar_lea.vmem %s911_s3, %s481_s22 }
  0x5f   : > { %v262_v14 = vmul.f32 %v458_v7, %v261_v13  ;;  %v274_v18 = vstv %s460_s7  ;;  %v265_v21 = vstv %s854_s20  ;;  %v470_v32 = vld [vmem:[%s842_s27 + $0x1] ss:$4 sm:$0x3]  ;;  %s476_s4 = sld [smem:[#allocation6 + $0x2]] }
  0x60   : > { %v251_v11 = vadd.f32 %v250_v6, %v245_v3  ;;  %v278_v19 = vstv %s462_s8  ;;  %v275_v22 = vmul.f32 %v274_v18, %v272_v9  ;;  %v283_v24 = vstv %s464_s9  ;;  %v472_v35 = vld [vmem:[%s842_s27 + $0x2] ss:$4 sm:$0x3]  ;;  %v474_v39 = vld [vmem:[%s842_s27 + $0x3] ss:$4 sm:$0x3] }
  0x61   : > { %v279_v23 = vmul.f32 %v461_v10, %v278_v19  ;;  %v284_v26 = vmul.f32 %v463_v16, %v283_v24  ;;  %v288_v27 = vstv %s858_s10  ;;  %v292_v40 = vstv %s862_s11 }
  0x62   : > { %v257_v17 = vadd.f32 %v256_v12, %v251_v11  ;;  %v289_v31 = vmul.f32 %v465_v20, %v288_v27  ;;  %v298_v34 = vstv %s469_s12  ;;  %v302_v38 = vstv %s865_s18 }
  0x63   : > { %v280_v30 = vadd.f32 %v279_v23, %v275_v22  ;;  %v299_v37 = vmul.f32 %v298_v34, %v296_v28  ;;  %v303_v41 = vmul.f32 %v470_v32, %v302_v38  ;;  %v307_v42 = vstv %s473_s23 }
  0x64   : > { %v263_v25 = vadd.f32 %v262_v14, %v257_v17  ;;  %v308_v44 = vmul.f32 %v472_v35, %v307_v42  ;;  %v312_v45 = vstv %s475_s28 }
  0x65   : > { %v285_v36 = vadd.f32 %v284_v26, %v280_v30  ;;  %v304_v46 = vadd.f32 %v303_v41, %v299_v37  ;;  %v313_v47 = vmul.f32 %v474_v39, %v312_v45  ;;  %v316_v50 = vstv %s476_s4 }
  0x66   : > { %v266_v33 = vadd.f32 %v265_v21, %v263_v25 }
  0x67   : > { %v290_v43 = vadd.f32 %v289_v31, %v285_v36  ;;  %v309_v49 = vadd.f32 %v308_v44, %v304_v46 }
  0x68   : > { %271 = vst.msk [vmem:[%s240_s30] ss:$4 sm:$0x3] %vm875_vm0, %v266_v33 }
  0x69   : > { %v293_v48 = vadd.f32 %v292_v40, %v290_v43  ;;  %v314_v51 = vadd.f32 %v313_v47, %v309_v49 }
  0x6b   : > { %468 = vst.msk [vmem:[%s240_s30 + $0x1] ss:$4 sm:$0x3] %vm875_vm0, %v293_v48  ;;  %v317_v52 = vadd.f32 %v316_v50, %v314_v51 }
  0x6d   : > { %477 = vst.msk [vmem:[%s240_s30 + $0x2] ss:$4 sm:$0x3] %vm875_vm0, %v317_v52 }
  0x6e PF: > { %s18_s17 = sadd.s32 1, %s674_s17   ;;  %s925_s12 = smov %s658_s13 }
  0x6f   : > { %p15_p3 = scmp.ge.s32.totalorder %s18_s17, 4   ;;  %s926_s13 = smov %s662_s14 }
  0x70   : > { %s927_s14 = smov %s792_s25  ;;  %s928_s15 = smov %s670_s16 }
  0x71   : > { %s929_s16 = smov %s931_s26  ;;  %17 = sbr.rel (!%p15_p3) target bundleno = 6 (0x6), region = 87 }
  0x78   :  { %350 = vsyncpa [#allocation3], 1 }
  0x79   :  { %352 = vsyncpa [#allocation3 + $0x1], 1 }
  0x7a   :  { %353 = vsyncpa [#allocation4], 1 }
  0x7b   :  { %355 = vsyncpa [#allocation4 + $0x1], 1 }
  0x7c   :  { %356 = vsyncpa [#allocation5], 1 }
  0x7d   :  { %358 = vsyncpa [#allocation5 + $0x1], 1 }

</bundles_post_ra>
